<compile_context>
chip_gen: v6e
topology: v6e:2x2x1
jax: 0.10.0
libtpu: 0.0.40
codegen_flags: <defaults>
</compile_context>

<pallas_src>
import jax
import jax.numpy as jnp
from jax.experimental import pallas as pl
from jax.experimental.pallas import tpu as pltpu

_LANE = 128
_MiB = 1024 * 1024


def _pick_b_tile(batch: int, max_tile: int = 16) -> int:
    """Largest divisor of `batch` that is <= max_tile (keeps the accumulator
    at <= ~32 vregs so it never spills inside the steady-state loop)."""
    if batch <= max_tile:
        return batch
    for t in range(max_tile, 0, -1):
        if batch % t == 0:
            return t
    return batch


def _tpu_vmem_plan():
    """Generation-aware sizing: (per-input block bytes, vmem_limit_bytes,
    multi_core_hint).  Resident footprint per step is roughly
    2 inputs x 2 pipeline buffers x block + ~2 block-equivalents of f32
    elementwise temporaries + the small accumulator."""
    try:
        cap = int(pltpu.get_tpu_info().vmem_capacity_bytes)
    except Exception:
        cap = 128 * _MiB  # conservative default: v5e/v6e-class part
    if cap <= 64 * _MiB:
        # v7x-like: 64 MiB VMEM per TensorCore, 2 TCs/chip, ~3.2 TB/s HBM.
        return 5 * _MiB, 48 * _MiB, True
    # v5e / v6e: 128 MiB VMEM, single TensorCore.
    return 10 * _MiB, 96 * _MiB, False


def _hm_sum_kernel_4d(pred_ref, gt_ref, out_ref):
    """Blocks: pred/gt (b_tile, g_tile, SUB, 128); out (b_tile, SUB, 128) f32.
    grid = (b, p, k); k (last) is the reduction axis -> resident accumulator."""
    k = pl.program_id(2)

    @pl.when(k == 0)
    def _():
        out_ref[...] = jnp.zeros_like(out_ref)

    d = pred_ref[...].astype(jnp.float32) - gt_ref[...].astype(jnp.float32)
    # Reduce over the g (non-minor) axis: plain VPU vreg adds; no cross-lane /
    # cross-sublane work in the steady state.
    out_ref[...] += jnp.sum(d * d, axis=1)


def _hm_sum_kernel_2d(pred_ref, gt_ref, out_ref):
    """Copy-free prefix path for N not a multiple of SUB*128.
    Blocks: pred/gt (B, chunk); out (B, 1) f32.  grid = (k,)."""
    k = pl.program_id(0)

    @pl.when(k == 0)
    def _():
        out_ref[...] = jnp.zeros_like(out_ref)

    d = pred_ref[...].astype(jnp.float32) - gt_ref[...].astype(jnp.float32)
    # Minor-axis reduce: vreg adds to combine lane columns + one cross-lane
    # reduce per step (XLU slot; negligible vs. the multi-MiB HBM stream).
    out_ref[...] += jnp.sum(d * d, axis=1, keepdims=True)


def heatmap_loss(pred: jax.Array, gt: jax.Array, *, force_pallas: bool = False) -> jax.Array:
    """Pallas TPU implementation of HeatmapLoss.forward. Returns shape (B,)."""
    assert pred.shape == gt.shape, "pred/gt shape mismatch"
    B = pred.shape[0]
    N = 1
    for s in pred.shape[1:]:
        N *= s

    itemsize = pred.dtype.itemsize
    sub = 16 if itemsize == 2 else 8          # 16-bit dtypes pack (16, 128)/vreg
    group = sub * _LANE                       # elements per dense tile per row
    G = N // group                            # whole groups per batch row
    f32 = jnp.float32

    # Small-input fast path: fixed pallas_call / grid overhead dominates and
    # XLA's fused reduction wins outright.  Also used when no full group fits.
    if (not force_pallas and 2 * B * N * itemsize < 4 * _MiB) or G == 0:
        d = pred.astype(f32) - gt.astype(f32)
        return jnp.mean(d * d, axis=tuple(range(1, pred.ndim))).astype(pred.dtype)

    blk_bytes, vmem_limit, multi_core = _tpu_vmem_plan()

    # Free (bitcast) flatten of the reduced axes; no data movement under jit.
    x_pred = pred.reshape(B, N)
    x_gt = gt.reshape(B, N)

    if N % group == 0:
        # ---------------- dense 4-D path (common case, fully copy-free) -----
        b_tile = _pick_b_tile(B)
        b_blocks = B // b_tile
        bytes_per_group_slab = b_tile * group * itemsize   # = 4 KiB * b_tile for f32/bf16
        g_budget = max(1, blk_bytes // bytes_per_group_slab)

        # Extra reduction split only where it can shard across v7x's 2 TCs and
        # the batch axis does not already provide parallel grid work.
        # TODO(synk): verify in xprof that "parallel" really shards this axis
        # across the two v7x TensorCores; if not, switch it to
        # pltpu.CORE_PARALLEL (or an explicit pl.core_map tensorcore mesh).
        P = 2 if (multi_core and b_blocks == 1 and G >= 2) else 1

        g_tile = max(1, min(g_budget, G // P))
        K = max(1, G // (P * g_tile))
        covered_groups = P * K * g_tile       # always <= G: no padding needed

        pred4 = x_pred.reshape(B, G, sub, _LANE)   # free bitcast
        gt4 = x_gt.reshape(B, G, sub, _LANE)

        in_spec = pl.BlockSpec((b_tile, g_tile, sub, _LANE),
                               lambda b, p, k: (b, p * K + k, 0, 0))
        out_spec = pl.BlockSpec((None, b_tile, sub, _LANE),
                                lambda b, p, k: (p, b, 0, 0))

        partials = pl.pallas_call(
            _hm_sum_kernel_4d,
            out_shape=jax.ShapeDtypeStruct((P, B, sub, _LANE), f32),
            grid_spec=pltpu.PrefetchScalarGridSpec(
                num_scalar_prefetch=0,
                grid=(b_blocks, P, K),
                in_specs=[in_spec, in_spec],
                out_specs=out_spec,
            ),
            compiler_params=pltpu.CompilerParams(
                dimension_semantics=("parallel", "parallel", "arbitrary"),
                vmem_limit_bytes=vmem_limit,
            ),
        )(pred4, gt4)
        kernel_sum = jnp.sum(partials, axis=(0, 2, 3))     # tiny final reduce
    else:
        # -------- copy-free prefix path: N not a multiple of sub*128 --------
        # The kernel streams only in-bounds (B, chunk) slabs of the flat view;
        # nothing is padded or sliced, so no extra HBM pass is introduced.
        # (Sublane occupancy is B/8 for B < 8 -- still HBM-bound; acceptable
        # for this uncommon shape class.)
        chunk_groups = max(1, min(blk_bytes // (B * group * itemsize), G))
        chunk = chunk_groups * group
        K = max(1, G // chunk_groups)
        covered_groups = K * chunk_groups

        partial = pl.pallas_call(
            _hm_sum_kernel_2d,
            out_shape=jax.ShapeDtypeStruct((B, 1), f32),
            grid_spec=pltpu.PrefetchScalarGridSpec(
                num_scalar_prefetch=0,
                grid=(K,),
                in_specs=[pl.BlockSpec((B, chunk), lambda k: (0, k)),
                          pl.BlockSpec((B, chunk), lambda k: (0, k))],
                out_specs=pl.BlockSpec((B, 1), lambda k: (0, 0)),
            ),
            compiler_params=pltpu.CompilerParams(
                dimension_semantics=("arbitrary",),
                vmem_limit_bytes=vmem_limit,
            ),
        )(x_pred, x_gt)
        kernel_sum = partial[:, 0]

    # Remainder not covered by the kernel (< ~one block per input in total):
    # reduced with plain jnp -- it reads only the bytes the kernel skipped.
    tail_start = covered_groups * group
    if tail_start < N:
        tp = x_pred[:, tail_start:].astype(f32)
        tg = x_gt[:, tail_start:].astype(f32)
        kernel_sum = kernel_sum + jnp.sum((tp - tg) ** 2, axis=1)

    loss = kernel_sum * (1.0 / float(N))   # single mean division, true N
    return loss.astype(pred.dtype)


if __name__ == "__main__":
    key = jax.random.PRNGKey(0)
    k1, k2, k3, k4, k5, k6 = jax.random.split(key, 6)
    B, C, H, W = 2, 4, 16, 16

    # 1) Aligned case (N = 4*16*16 = 1024): dense 4-D kernel path.
    pred = jax.random.normal(k1, (B, C, H, W), dtype=jnp.float32)
    gt = jax.random.normal(k2, (B, C, H, W), dtype=jnp.float32)
    loss = jax.block_until_ready(heatmap_loss(pred, gt, force_pallas=True))
    ref = jnp.mean(jnp.mean(jnp.mean((pred - gt) ** 2, axis=3), axis=2), axis=1)
    assert loss.shape == (B,)
    assert jnp.allclose(loss, ref, rtol=1e-5, atol=1e-5), (loss, ref)

    # Small-input fast path (same inputs, not forced) must agree too.
    loss_fast = jax.block_until_ready(heatmap_loss(pred, gt))
    assert jnp.allclose(loss_fast, ref, rtol=1e-5, atol=1e-5), (loss_fast, ref)

    # 2) Unaligned case (N = 5*16*16 = 1280): copy-free 2-D prefix path + jnp tail.
    pred2 = jax.random.normal(k3, (B, 5, H, W), dtype=jnp.float32)
    gt2 = jax.random.normal(k4, (B, 5, H, W), dtype=jnp.float32)
    loss2 = jax.block_until_ready(heatmap_loss(pred2, gt2, force_pallas=True))
    ref2 = jnp.mean(jnp.mean(jnp.mean((pred2 - gt2) ** 2, axis=3), axis=2), axis=1)
    assert jnp.allclose(loss2, ref2, rtol=1e-5, atol=1e-5), (loss2, ref2)

    # 3) bf16 inputs (N = 8*16*16 = 2048): (16, 128)-packed 4-D path.
    pred3 = jax.random.normal(k5, (B, 8, H, W), dtype=jnp.float32).astype(jnp.bfloat16)
    gt3 = jax.random.normal(k6, (B, 8, H, W), dtype=jnp.float32).astype(jnp.bfloat16)
    loss3 = jax.block_until_ready(heatmap_loss(pred3, gt3, force_pallas=True))
    d3 = pred3.astype(jnp.float32) - gt3.astype(jnp.float32)
    ref3 = jnp.mean(d3 * d3, axis=(1, 2, 3))
    assert jnp.allclose(loss3.astype(jnp.float32), ref3, rtol=2e-2, atol=2e-2), (loss3, ref3)

    print("KERNEL_OK")
</pallas_src>

<mosaic_0001>
module attributes {stable_mosaic.version = 11 : i64} {
  func.func @_hm_sum_kernel_4d(%arg0: i32, %arg1: i32, %arg2: i32, %arg3: memref<2x1x8x128xf32, #tpu.memory_space<vmem>>, %arg4: memref<2x1x8x128xf32, #tpu.memory_space<vmem>>, %arg5: memref<1x2x8x128xf32, #tpu.memory_space<vmem>>) attributes {dimension_semantics = [#tpu.dimension_semantics<parallel>, #tpu.dimension_semantics<parallel>, #tpu.dimension_semantics<arbitrary>], iteration_bounds = array<i64: 1, 1, 1>, scalar_prefetch = 0 : i64, scratch_operands = 0 : i64, tpu.core_type = #tpu.core_type<tc>, window_params = [{transform_indices = @transform_0, window_bounds = array<i64: 2, 1, 8, 128>}, {transform_indices = @transform_1, window_bounds = array<i64: 2, 1, 8, 128>}, {transform_indices = @transform_2, window_bounds = array<i64: 1, 2, 8, 128>}]} {
    %c0_i32 = arith.constant 0 : i32
    %0 = arith.cmpi eq, %arg2, %c0_i32 : i32
    %1 = arith.extui %0 : i1 to i32
    %c0_i32_0 = arith.constant 0 : i32
    %2 = arith.cmpi ne, %1, %c0_i32_0 : i32
    scf.if %2 {
      %cst_16 = arith.constant 0.000000e+00 : f32
      %14 = vector.broadcast %cst_16 : f32 to vector<2x8x128xf32>
      %c0_17 = arith.constant 0 : index
      %c0_18 = arith.constant 0 : index
      %c0_19 = arith.constant 0 : index
      %c0_20 = arith.constant 0 : index
      %15 = vector.load %arg5[%c0_17, %c0_18, %c0_19, %c0_20] : memref<1x2x8x128xf32, #tpu.memory_space<vmem>>, vector<1x2x8x128xf32>
      %16 = vector.shape_cast %15 : vector<1x2x8x128xf32> to vector<2x8x128xf32>
      %17 = vector.shape_cast %14 : vector<2x8x128xf32> to vector<1x2x8x128xf32>
      tpu.vector_store %arg5[%c0_17, %c0_18, %c0_19, %c0_20], %17 {strides = array<i32>} : memref<1x2x8x128xf32, #tpu.memory_space<vmem>>, vector<1x2x8x128xf32>,
    } else {
    }
    %c0 = arith.constant 0 : index
    %c0_1 = arith.constant 0 : index
    %c0_2 = arith.constant 0 : index
    %c0_3 = arith.constant 0 : index
    %3 = vector.load %arg3[%c0, %c0_1, %c0_2, %c0_3] : memref<2x1x8x128xf32, #tpu.memory_space<vmem>>, vector<2x1x8x128xf32>
    %c0_4 = arith.constant 0 : index
    %c0_5 = arith.constant 0 : index
    %c0_6 = arith.constant 0 : index
    %c0_7 = arith.constant 0 : index
    %4 = vector.load %arg4[%c0_4, %c0_5, %c0_6, %c0_7] : memref<2x1x8x128xf32, #tpu.memory_space<vmem>>, vector<2x1x8x128xf32>
    %5 = arith.subf %3, %4 : vector<2x1x8x128xf32>
    %c0_8 = arith.constant 0 : index
    %c0_9 = arith.constant 0 : index
    %c0_10 = arith.constant 0 : index
    %c0_11 = arith.constant 0 : index
    %6 = vector.load %arg5[%c0_8, %c0_9, %c0_10, %c0_11] : memref<1x2x8x128xf32, #tpu.memory_space<vmem>>, vector<1x2x8x128xf32>
    %7 = vector.shape_cast %6 : vector<1x2x8x128xf32> to vector<2x8x128xf32>
    %8 = arith.mulf %5, %5 : vector<2x1x8x128xf32>
    %cst = arith.constant dense<0.000000e+00> : vector<2x8x128xf32>
    %9 = vector.multi_reduction <add>, %8, %cst [1] : vector<2x1x8x128xf32> to vector<2x8x128xf32>
    %10 = arith.addf %7, %9 : vector<2x8x128xf32>
    %c0_12 = arith.constant 0 : index
    %c0_13 = arith.constant 0 : index
    %c0_14 = arith.constant 0 : index
    %c0_15 = arith.constant 0 : index
    %11 = vector.load %arg5[%c0_12, %c0_13, %c0_14, %c0_15] : memref<1x2x8x128xf32, #tpu.memory_space<vmem>>, vector<1x2x8x128xf32>
    %12 = vector.shape_cast %11 : vector<1x2x8x128xf32> to vector<2x8x128xf32>
    %13 = vector.shape_cast %10 : vector<2x8x128xf32> to vector<1x2x8x128xf32>
    tpu.vector_store %arg5[%c0_12, %c0_13, %c0_14, %c0_15], %13 {strides = array<i32>} : memref<1x2x8x128xf32, #tpu.memory_space<vmem>>, vector<1x2x8x128xf32>,
    return
  }
  func.func @transform_0(%arg0: i32, %arg1: i32, %arg2: i32) -> (i32, i32, i32, i32) {
    %c1_i32 = arith.constant 1 : i32
    %0 = arith.muli %arg1, %c1_i32 : i32
    %1 = arith.addi %0, %arg2 : i32
    %c0_i32 = arith.constant 0 : i32
    %c0_i32_0 = arith.constant 0 : i32
    %c0_i32_1 = arith.constant 0 : i32
    return %arg0, %1, %c0_i32, %c0_i32_0 : i32, i32, i32, i32
  }
  func.func @transform_1(%arg0: i32, %arg1: i32, %arg2: i32) -> (i32, i32, i32, i32) {
    %c1_i32 = arith.constant 1 : i32
    %0 = arith.muli %arg1, %c1_i32 : i32
    %1 = arith.addi %0, %arg2 : i32
    %c0_i32 = arith.constant 0 : i32
    %c0_i32_0 = arith.constant 0 : i32
    %c0_i32_1 = arith.constant 0 : i32
    return %arg0, %1, %c0_i32, %c0_i32_0 : i32, i32, i32, i32
  }
  func.func @transform_2(%arg0: i32, %arg1: i32, %arg2: i32) -> (i32, i32, i32, i32) {
    %c0_i32 = arith.constant 0 : i32
    %c0_i32_0 = arith.constant 0 : i32
    %c0_i32_1 = arith.constant 0 : i32
    return %arg1, %arg0, %c0_i32, %c0_i32_0 : i32, i32, i32, i32
  }
}

</mosaic_0001>

<bundles_post_ra>
// kernel: tpu_custom_call.1
= control target key start
LH: loop header
LB: loop body
LE: loop exit
PB: predicated region body
PF: predicated region fallthrough
CT: control target
= control target key end

     0   :  { %7 = vsyncpa [#allocation3], 0  ;;  %s198_s0 = inlined_call_operand.hbm [shape: f32[2,1,8,128], index: 0, kind: input, shape index: {}]   ;;  %s199_s1 = inlined_call_operand.hbm [shape: f32[2,1,8,128], index: 1, kind: input, shape index: {}]   ;;  %s200_s2 = inlined_call_operand.hbm [shape: f32[1,2,8,128], index: 2, kind: output, shape index: {}]  }
   0x1   :  { %8 = vsyncpa [#allocation6], 0 }
   0x2   :  { %9 = vsyncpa [#allocation4], 0  ;;  %s160_s9 = smov [#allocation2]  }
   0x3   :  { %s18_s10 = sshll.u32 %s160_s9, 4  ;;  %s19_s10 = int_to_ptr.vmem [resolvable:$true] %s18_s10 }
   0x4   :  { %s102_s11 = scalar_lea.vmem %s19_s10, 256  ;;  %p107_p1 = scmp.lt.s32.totalorder %s19_s10, %s19_s10 }
   0x5   :  { %p103_p0 = scmp.ne.s32.totalorder %s19_s10, %s102_s11  ;;  %p108_p2 = scmp.lt.s32.totalorder %s102_s11, %s102_s11 }
   0x7   :  { %p109_p3 = por %p108_p2, %p107_p1 }
   0x9   :  { %p110_p4 = pnand %p109_p3, %p103_p0 }
   0xb   :  { %113 = shalt.err (!%p110_p4)
}
   0xc   :  { %s161_s12 = smov 128   ;;  %s162_s13 = smov 8  }
   0xd   :  { %24 = dma.hbm_to_vmem [thread:$0]  %s198_s0, 256, %s19_s10, [#allocation3], %s161_s12, %s161_s12, %s162_s13  }
   0xe   :  { %s163_s16 = smov [#allocation5]  }
   0xf   :  { %s33_s17 = sshll.u32 %s163_s16, 4  ;;  %s34_s17 = int_to_ptr.vmem [resolvable:$true] %s33_s17 }
  0x10   :  { %s122_s18 = scalar_lea.vmem %s34_s17, 256  ;;  %p127_p6 = scmp.lt.s32.totalorder %s34_s17, %s34_s17 }
  0x11   :  { %p123_p5 = scmp.ne.s32.totalorder %s34_s17, %s122_s18  ;;  %p128_p7 = scmp.lt.s32.totalorder %s122_s18, %s122_s18 }
  0x13   :  { %p129_p8 = por %p128_p7, %p127_p6 }
  0x15   :  { %p130_p9 = pnand %p129_p8, %p123_p5 }
  0x17   :  { %133 = shalt.err (!%p130_p9)
}
  0x18   :  { %39 = dma.hbm_to_vmem [thread:$0]  %s199_s1, 256, %s34_s17, [#allocation6], %s161_s12, %s161_s12, %s162_s13  }
  0x19   :  { %154 = dma.done.wait [#allocation3], 256  }
  0x1a   :  { %155 = vsyncadd [#allocation3], 4294967040 }
  0x1b   :  { %156 = dma.done.wait [#allocation6], 256  }
  0x1c   :  { %157 = vsyncadd [#allocation6], 4294967040  ;;  %v54_v0 = vld [vmem:[#allocation2] sm:$0xff]  ;;  %v56_v1 = vld [vmem:[#allocation5] sm:$0xff]  ;;  %s164_s0 = smov [#allocation7]  }
  0x1d   :  { %v55_v2 = vld [vmem:[#allocation2 + $0x8] sm:$0xff]  ;;  %v58_v3 = vsub.f32 %v54_v0, %v56_v1  ;;  %v57_v4 = vld [vmem:[#allocation5 + $0x8] sm:$0xff]  ;;  %s75_s21 = sshll.u32 %s164_s0, 4  ;;  %s76_s21 = int_to_ptr.vmem [resolvable:$true] %s75_s21 }
  0x1e   :  { %v59_v5 = vsub.f32 %v55_v2, %v57_v4  ;;  %s134_s22 = scalar_lea.vmem %s76_s21, 256  ;;  %p139_p11 = scmp.lt.s32.totalorder %s76_s21, %s76_s21 }
  0x1f   :  { %v62_v6 = vmul.f32 %v58_v3, %v58_v3  ;;  %p135_p10 = scmp.ne.s32.totalorder %s76_s21, %s134_s22  ;;  %p140_p12 = scmp.lt.s32.totalorder %s134_s22, %s134_s22 }
  0x20   :  { %v63_v7 = vmul.f32 %v59_v5, %v59_v5 }
  0x21   :  { %68 = vst [vmem:[#allocation7] sm:$0xff] %v62_v6  ;;  %p141_p13 = por %p140_p12, %p139_p11 }
  0x22   :  { %69 = vst [vmem:[#allocation7 + $0x8] sm:$0xff] %v63_v7 }
  0x23   :  { %p142_p0 = pnand %p141_p13, %p135_p10 }
  0x25   :  { %145 = shalt.err (!%p142_p0)
}
  0x26   :  { %81 = dma.vmem_to_hbm [thread:$0]  %s76_s21, 256, %s200_s2, [#allocation4], %s161_s12, %s161_s12, %s162_s13  }
  0x27   :  { %158 = dma.done.wait [#allocation4], 256  }
  0x28   :  { %159 = vsyncadd [#allocation4], 4294967040 }
  0x29   :  { %85 = vsyncpa [#allocation3], 1 }
  0x2a   :  { %86 = vsyncpa [#allocation6], 1 }
  0x2b   :  { %87 = vsyncpa [#allocation4], 1 }

</bundles_post_ra>
